<compile_context>
chip_gen: v5e
topology: v5e:2x2
jax: 0.10.0
libtpu: 0.0.40
codegen_flags: <defaults>
</compile_context>

<pallas_src>
import jax
import jax.numpy as jnp
from jax.experimental import pallas as pl
from jax.experimental.pallas import tpu as pltpu


def _round_up(x, m):
    return ((x + m - 1) // m) * m


# ----------------------------- Pallas kernel -----------------------------

def _cond_linear_kernel(x_ref, w_ref, b_ref, e_ref, t_ref, o_ref):
    """o = ((x @ w) + bias) * embed[t] ; grid = (M_tiles, N_tiles, K_tiles).

    x_ref: (tm, tk) bf16     w_ref: (tk, tn) bf16
    b_ref: (1, tn) f32       e_ref: (Sp, tn) f32 (padded embedding table)
    t_ref: (tm, 1) int32     o_ref: (tm, tn) f32 (resident across k)
    """
    k = pl.program_id(2)

    @pl.when(k == 0)
    def _():
        o_ref[...] = jnp.zeros_like(o_ref)

    # MXU main loop: accumulate directly into the resident f32 output block.
    o_ref[...] += jnp.dot(x_ref[...], w_ref[...],
                          preferred_element_type=jnp.float32)

    @pl.when(k == pl.num_programs(2) - 1)
    def _():
        tm = t_ref.shape[0]
        n_steps_pad = e_ref.shape[0]
        # In-kernel embedding gather: one-hot(t) @ embed_tile (exact — each
        # row of the one-hot selects exactly one embedding row).
        t_tile = t_ref[...]                                       # (tm, 1)
        steps = jax.lax.broadcasted_iota(jnp.int32, (tm, n_steps_pad), 1)
        onehot = (t_tile == steps).astype(jnp.float32)            # (tm, Sp)
        gamma = jnp.dot(onehot, e_ref[...],
                        preferred_element_type=jnp.float32)       # (tm, tn)
        o_ref[...] = (o_ref[...] + b_ref[...]) * gamma


# ----------------------------- wrapper -----------------------------

def conditional_linear(x, t, w, b, embed_w, *,
                       tm=512, tn=512, tk=512,
                       mxu_dtype=jnp.bfloat16,
                       vmem_limit_bytes=48 * 1024 * 1024):
    """Equivalent of ConditionalLinear.forward.

    x:       [M, K] float input
    t:       [M] int timestep indices (0 <= t < n_steps)
    w:       [K, N] linear weight, already transposed (torch lin.weight.T)
    b:       [N] linear bias
    embed_w: [n_steps, N] embedding table
    returns  [M, N] float32
    """
    M, K = x.shape
    Kw, N = w.shape
    n_steps = embed_w.shape[0]
    assert K == Kw and embed_w.shape[1] == N and t.shape == (M,)

    # --- tile sizing ---------------------------------------------------
    # Clamp to the (padded) problem size; 16-sublane granularity on M (bf16
    # packing), 128-lane granularity on N/K.
    tm = min(tm, _round_up(M, 16))
    tn = min(tn, _round_up(N, 128))

    # tk: divide round_up(K, 128) exactly so no K padding / wasted DMA.
    k128 = _round_up(K, 128)
    if k128 <= tk:
        tk = k128
    else:
        cand = tk - (tk % 128)
        while k128 % cand != 0:
            cand -= 128
        tk = cand

    Mp, Kp, Np = _round_up(M, tm), k128, _round_up(N, tn)

    # v7x megacore: if the parallel (M, N) sub-grid would be a single tile,
    # split N so both TensorCores get work.
    if Mp // tm == 1 and Np // tn == 1 and tn % 256 == 0:
        tn //= 2

    # Embedding table rows padded to a lane-friendly contraction size.
    Sp = _round_up(n_steps, 128)

    # --- operand prep (conditional: no extra HBM passes when aligned) ---
    # TODO(synk): for repeated calls, hoist the W/b/embed padding+cast out of
    # the hot path (weights are static across calls).
    def _prep2d(a, rows, cols, dtype):
        if a.shape != (rows, cols):
            a = jnp.pad(a, ((0, rows - a.shape[0]), (0, cols - a.shape[1])))
        return a if a.dtype == dtype else a.astype(dtype)

    xp = _prep2d(x, Mp, Kp, mxu_dtype)
    wp = _prep2d(w, Kp, Np, mxu_dtype)
    bp = _prep2d(b.reshape(1, N), 1, Np, jnp.float32)
    ep = _prep2d(embed_w, Sp, Np, jnp.float32)

    tp = t.astype(jnp.int32)
    if Mp != M:
        tp = jnp.pad(tp, (0, Mp - M))
    tp = tp.reshape(Mp, 1)

    grid = (Mp // tm, Np // tn, Kp // tk)

    out = pl.pallas_call(
        _cond_linear_kernel,
        out_shape=jax.ShapeDtypeStruct((Mp, Np), jnp.float32),
        grid_spec=pltpu.PrefetchScalarGridSpec(
            num_scalar_prefetch=0,
            grid=grid,
            in_specs=[
                pl.BlockSpec((tm, tk), lambda i, j, k: (i, k)),   # x
                pl.BlockSpec((tk, tn), lambda i, j, k: (k, j)),   # w
                pl.BlockSpec((1, tn), lambda i, j, k: (0, j)),    # bias
                pl.BlockSpec((Sp, tn), lambda i, j, k: (0, j)),   # embed table
                pl.BlockSpec((tm, 1), lambda i, j, k: (i, 0)),    # t indices
            ],
            out_specs=pl.BlockSpec((tm, tn), lambda i, j, k: (i, j)),
        ),
        compiler_params=pltpu.CompilerParams(
            dimension_semantics=("parallel", "parallel", "arbitrary"),
            vmem_limit_bytes=vmem_limit_bytes,
        ),
    )(xp, wp, bp, ep, tp)

    if (Mp, Np) == (M, N):
        return out
    return out[:M, :N]


# ----------------------------- parameters -----------------------------

def make_params(num_in, num_out, n_steps, seed=0):
    key = jax.random.PRNGKey(seed)
    k_w, k_b, k_e = jax.random.split(key, 3)
    bound = 1.0 / jnp.sqrt(jnp.float32(num_in))
    # torch nn.Linear default init (uniform(-1/sqrt(fan_in), 1/sqrt(fan_in))),
    # stored pre-transposed as [num_in, num_out].
    w = jax.random.uniform(k_w, (num_in, num_out), jnp.float32,
                           minval=-bound, maxval=bound)
    b = jax.random.uniform(k_b, (num_out,), jnp.float32,
                           minval=-bound, maxval=bound)
    # embed.weight.data.uniform_() -> U[0, 1)
    embed_w = jax.random.uniform(k_e, (n_steps, num_out), jnp.float32)
    return w, b, embed_w


# ----------------------------- main -----------------------------

if __name__ == "__main__":
    batch, num_in, num_out, n_steps = 16, 32, 64, 10

    key = jax.random.PRNGKey(0)
    k_x, k_t = jax.random.split(key)
    x = jax.random.normal(k_x, (batch, num_in), dtype=jnp.float32)
    t = jax.random.randint(k_t, (batch,), 0, n_steps, dtype=jnp.int32)

    w, b, embed_w = make_params(num_in, num_out, n_steps, seed=0)

    out = conditional_linear(x, t, w, b, embed_w)
    out = jax.block_until_ready(out)

    # Pure-JAX reference (f32): gamma.view(-1, num_out) * (x @ W^T + b)
    gamma_ref = jnp.take(embed_w, t, axis=0)
    ref = gamma_ref * (x @ w + b)

    assert out.shape == (batch, num_out), out.shape
    assert out.dtype == jnp.float32
    assert bool(jnp.all(jnp.isfinite(out)))
    # bf16 MXU operands vs f32 reference -> loose tolerance
    assert bool(jnp.allclose(out, ref, rtol=2e-2, atol=2e-2)), (
        float(jnp.max(jnp.abs(out - ref))))

    print("KERNEL_OK")
</pallas_src>

<mosaic_0001>
module attributes {stable_mosaic.version = 11 : i64} {
  func.func @_cond_linear_kernel(%arg0: i32, %arg1: i32, %arg2: i32, %arg3: memref<16x128xbf16, #tpu.memory_space<vmem>>, %arg4: memref<128x128xbf16, #tpu.memory_space<vmem>>, %arg5: memref<1x128xf32, #tpu.memory_space<vmem>>, %arg6: memref<128x128xf32, #tpu.memory_space<vmem>>, %arg7: memref<16x1xi32, #tpu.memory_space<vmem>>, %arg8: memref<16x128xf32, #tpu.memory_space<vmem>>) attributes {dimension_semantics = [#tpu.dimension_semantics<parallel>, #tpu.dimension_semantics<parallel>, #tpu.dimension_semantics<arbitrary>], iteration_bounds = array<i64: 1, 1, 1>, scalar_prefetch = 0 : i64, scratch_operands = 0 : i64, tpu.core_type = #tpu.core_type<tc>, window_params = [{transform_indices = @transform_0, window_bounds = array<i64: 16, 128>}, {transform_indices = @transform_1, window_bounds = array<i64: 128, 128>}, {transform_indices = @transform_2, window_bounds = array<i64: 1, 128>}, {transform_indices = @transform_3, window_bounds = array<i64: 128, 128>}, {transform_indices = @transform_4, window_bounds = array<i64: 16, 1>}, {transform_indices = @transform_5, window_bounds = array<i64: 16, 128>}]} {
    %c0_i32 = arith.constant 0 : i32
    %0 = arith.cmpi eq, %arg2, %c0_i32 : i32
    %1 = arith.extui %0 : i1 to i32
    %c0_i32_0 = arith.constant 0 : i32
    %2 = arith.cmpi ne, %1, %c0_i32_0 : i32
    scf.if %2 {
      %cst_10 = arith.constant 0.000000e+00 : f32
      %12 = vector.broadcast %cst_10 : f32 to vector<16x128xf32>
      %c0_11 = arith.constant 0 : index
      %c0_12 = arith.constant 0 : index
      %13 = vector.load %arg8[%c0_11, %c0_12] : memref<16x128xf32, #tpu.memory_space<vmem>>, vector<16x128xf32>
      tpu.vector_store %arg8[%c0_11, %c0_12], %12 {strides = array<i32>} : memref<16x128xf32, #tpu.memory_space<vmem>>, vector<16x128xf32>,
    } else {
    }
    %c0 = arith.constant 0 : index
    %c0_1 = arith.constant 0 : index
    %3 = vector.load %arg8[%c0, %c0_1] : memref<16x128xf32, #tpu.memory_space<vmem>>, vector<16x128xf32>
    %c0_2 = arith.constant 0 : index
    %c0_3 = arith.constant 0 : index
    %4 = vector.load %arg3[%c0_2, %c0_3] : memref<16x128xbf16, #tpu.memory_space<vmem>>, vector<16x128xbf16>
    %c0_4 = arith.constant 0 : index
    %c0_5 = arith.constant 0 : index
    %5 = vector.load %arg4[%c0_4, %c0_5] : memref<128x128xbf16, #tpu.memory_space<vmem>>, vector<128x128xbf16>
    %cst = arith.constant dense<0.000000e+00> : vector<16x128xf32>
    %6 = tpu.matmul %4, %5, %cst {dimension_numbers = #tpu.dot_dimension_numbers<[1], [0], [0], [1], [0, 0, 1, 1], [], []>} : vector<16x128xbf16>, vector<128x128xbf16>, vector<16x128xf32> -> vector<16x128xf32>
    %7 = arith.addf %3, %6 : vector<16x128xf32>
    %c0_6 = arith.constant 0 : index
    %c0_7 = arith.constant 0 : index
    %8 = vector.load %arg8[%c0_6, %c0_7] : memref<16x128xf32, #tpu.memory_space<vmem>>, vector<16x128xf32>
    tpu.vector_store %arg8[%c0_6, %c0_7], %7 {strides = array<i32>} : memref<16x128xf32, #tpu.memory_space<vmem>>, vector<16x128xf32>,
    %c0_i32_8 = arith.constant 0 : i32
    %9 = arith.cmpi eq, %arg2, %c0_i32_8 : i32
    %10 = arith.extui %9 : i1 to i32
    %c0_i32_9 = arith.constant 0 : i32
    %11 = arith.cmpi ne, %10, %c0_i32_9 : i32
    scf.if %11 {
      %c0_10 = arith.constant 0 : index
      %c0_11 = arith.constant 0 : index
      %12 = vector.load %arg7[%c0_10, %c0_11] : memref<16x1xi32, #tpu.memory_space<vmem>>, vector<16x1xi32>
      %13 = tpu.iota {dimensions = array<i32: 1>} : vector<16x128xi32>
      %14 = vector.broadcast %12 : vector<16x1xi32> to vector<16x128xi32>
      %15 = arith.cmpi eq, %14, %13 : vector<16x128xi32>
      %16 = arith.extui %15 : vector<16x128xi1> to vector<16x128xi32>
      %17 = arith.sitofp %16 : vector<16x128xi32> to vector<16x128xf32>
      %c0_12 = arith.constant 0 : index
      %c0_13 = arith.constant 0 : index
      %18 = vector.load %arg6[%c0_12, %c0_13] : memref<128x128xf32, #tpu.memory_space<vmem>>, vector<128x128xf32>
      %cst_14 = arith.constant dense<0.000000e+00> : vector<16x128xf32>
      %19 = tpu.matmul %17, %18, %cst_14 {dimension_numbers = #tpu.dot_dimension_numbers<[1], [0], [0], [1], [0, 0, 1, 1], [], []>} : vector<16x128xf32>, vector<128x128xf32>, vector<16x128xf32> -> vector<16x128xf32>
      %c0_15 = arith.constant 0 : index
      %c0_16 = arith.constant 0 : index
      %20 = vector.load %arg8[%c0_15, %c0_16] : memref<16x128xf32, #tpu.memory_space<vmem>>, vector<16x128xf32>
      %c0_17 = arith.constant 0 : index
      %c0_18 = arith.constant 0 : index
      %21 = vector.load %arg5[%c0_17, %c0_18] : memref<1x128xf32, #tpu.memory_space<vmem>>, vector<1x128xf32>
      %22 = vector.broadcast %21 : vector<1x128xf32> to vector<16x128xf32>
      %23 = arith.addf %20, %22 : vector<16x128xf32>
      %24 = arith.mulf %23, %19 : vector<16x128xf32>
      %c0_19 = arith.constant 0 : index
      %c0_20 = arith.constant 0 : index
      %25 = vector.load %arg8[%c0_19, %c0_20] : memref<16x128xf32, #tpu.memory_space<vmem>>, vector<16x128xf32>
      tpu.vector_store %arg8[%c0_19, %c0_20], %24 {strides = array<i32>} : memref<16x128xf32, #tpu.memory_space<vmem>>, vector<16x128xf32>,
    } else {
    }
    return
  }
  func.func @transform_0(%arg0: i32, %arg1: i32, %arg2: i32) -> (i32, i32) {
    %c0_i32 = arith.constant 0 : i32
    return %arg0, %arg2 : i32, i32
  }
  func.func @transform_1(%arg0: i32, %arg1: i32, %arg2: i32) -> (i32, i32) {
    %c0_i32 = arith.constant 0 : i32
    return %arg2, %arg1 : i32, i32
  }
  func.func @transform_2(%arg0: i32, %arg1: i32, %arg2: i32) -> (i32, i32) {
    %c0_i32 = arith.constant 0 : i32
    %c0_i32_0 = arith.constant 0 : i32
    return %c0_i32, %arg1 : i32, i32
  }
  func.func @transform_3(%arg0: i32, %arg1: i32, %arg2: i32) -> (i32, i32) {
    %c0_i32 = arith.constant 0 : i32
    %c0_i32_0 = arith.constant 0 : i32
    return %c0_i32, %arg1 : i32, i32
  }
  func.func @transform_4(%arg0: i32, %arg1: i32, %arg2: i32) -> (i32, i32) {
    %c0_i32 = arith.constant 0 : i32
    %c0_i32_0 = arith.constant 0 : i32
    return %arg0, %c0_i32 : i32, i32
  }
  func.func @transform_5(%arg0: i32, %arg1: i32, %arg2: i32) -> (i32, i32) {
    %c0_i32 = arith.constant 0 : i32
    return %arg0, %arg1 : i32, i32
  }
}

</mosaic_0001>

<bundles_post_ra>
// kernel: tpu_custom_call.1
= control target key start
LH: loop header
LB: loop body
LE: loop exit
PB: predicated region body
PF: predicated region fallthrough
CT: control target
= control target key end

     0   :  { %10 = vsyncpa [#allocation3], 0  ;;  %s446_s0 = inlined_call_operand.vmem [shape: bf16[16,128], index: 0, kind: input, shape index: {}]   ;;  %s447_s1 = inlined_call_operand.hbm [shape: bf16[128,128], index: 1, kind: input, shape index: {}]   ;;  %s448_s2 = inlined_call_operand.vmem [shape: f32[1,128], index: 2, kind: input, shape index: {}]   ;;  %s449_s3 = inlined_call_operand.hbm [shape: f32[128,128], index: 3, kind: input, shape index: {}]   ;;  %s450_s4 = inlined_call_operand.vmem [shape: s32[16,1], index: 4, kind: input, shape index: {}]   ;;  %s451_s5 = inlined_call_operand.hbm [shape: f32[16,128], index: 5, kind: output, shape index: {}]  }
   0x1   :  { %11 = vsyncpa [#allocation6], 0 }
   0x2   :  { %12 = vsyncpa [#allocation4], 0  ;;  %s19_s20 = sshll.u32 %s447_s1, 4  ;;  %s380_s21 = smov [#allocation2]   ;;  %s20_s20 = int_to_ptr.hbm [resolvable:$true] %s19_s20 }
   0x3   :  { %s21_s22 = sshll.u32 %s380_s21, 4  ;;  %s34_s25 = sshll.u32 %s449_s3, 4  ;;  %s22_s22 = int_to_ptr.vmem [resolvable:$true] %s21_s22  ;;  %s35_s25 = int_to_ptr.hbm [resolvable:$true] %s34_s25 }
   0x4   :  { %s381_s26 = smov 64   ;;  %s382_s27 = smov 4  }
   0x5   :  { %27 = dma.hbm_to_vmem [thread:$0]  %s20_s20, 1024, %s22_s22, [#allocation3], %s381_s26, %s381_s26, %s382_s27  }
   0x6   :  { %s383_s28 = smov [#allocation5]   ;;  %s384_s30 = smov 128  }
   0x7   :  { %s36_s29 = sshll.u32 %s383_s28, 4  ;;  %s385_s6 = smov 8   ;;  %s37_s29 = int_to_ptr.vmem [resolvable:$true] %s36_s29 }
   0x8   :  { %42 = dma.hbm_to_vmem [thread:$0]  %s35_s25, 2048, %s37_s29, [#allocation6], %s384_s30, %s384_s30, %s385_s6  }
   0x9   :  { %374 = dma.done.wait [#allocation3], 1024  }
   0xa   :  { %375 = vsyncadd [#allocation3], 4294966272 }
   0xb   :  { %376 = dma.done.wait [#allocation6], 2048  }
   0xc   :  { %377 = vsyncadd [#allocation6], 4294965248  ;;  %v386_v0 = vmov 0   ;;  %v154_v1 = vld [vmem:[%s450_s4] sm:$0xff]  ;;  %v289_v2 = vld [vmem:[#allocation2 + $0x38] sm:$0xff]  ;;  %v156_v28 = vlaneseq  ;;  %v387_v31 = vmov 1.0  }
   0xd   :  { %300 = vset.pattern.permute.xlu0 %v386_v0  ;;  %133 = vmatpush.bf16.msra.mxu0 %v289_v2  ;;  %v288_v3 = vld [vmem:[#allocation2 + $0x30] sm:$0xff]  ;;  %v185_v4 = vld [vmem:[#allocation5 + $0x78] sm:$0xff]  ;;  %v183_v6 = vld [vmem:[#allocation5 + $0x68] sm:$0xff]  ;;  %s227_s15 = sshll.u32 %s451_s5, 4  ;;  %s228_s15 = int_to_ptr.hbm [resolvable:$true] %s227_s15 }
   0xe   :  { %159 = vperm.xlu0 %300, %v154_v1   ;;  %186 = vmatpush.msra.mxu1 %v185_v4  ;;  %v184_v5 = vld [vmem:[#allocation5 + $0x70] sm:$0xff]  ;;  %v155_v7 = vld [vmem:[%s450_s4 + $0x8] sm:$0xff]  ;;  %v182_v9 = vld [vmem:[#allocation5 + $0x60] sm:$0xff]  ;;  %v157_v29 = vand.u32 127, %v156_v28 }
   0xf   :  { %v287_v8 = vld [vmem:[#allocation2 + $0x28] sm:$0xff]  ;;  %v181_v10 = vld [vmem:[#allocation5 + $0x58] sm:$0xff]  ;;  %v286_v11 = vld [vmem:[#allocation2 + $0x20] sm:$0xff] }
  0x10   :  { %187 = vmatpush.msra.mxu1 %v184_v5  ;;  %v180_v12 = vld [vmem:[#allocation5 + $0x50] sm:$0xff]  ;;  %v179_v13 = vld [vmem:[#allocation5 + $0x48] sm:$0xff]  ;;  %v285_v14 = vld [vmem:[#allocation2 + $0x18] sm:$0xff] }
  0x11   :  { %134 = vmatpush.bf16.msra.mxu0 %v288_v3  ;;  %v178_v15 = vld [vmem:[#allocation5 + $0x40] sm:$0xff]  ;;  %v177_v16 = vld [vmem:[#allocation5 + $0x38] sm:$0xff]  ;;  %v284_v17 = vld [vmem:[#allocation2 + $0x10] sm:$0xff] }
  0x12   :  { %188 = vmatpush.msra.mxu1 %v183_v6  ;;  %v176_v18 = vld [vmem:[#allocation5 + $0x30] sm:$0xff]  ;;  %v175_v19 = vld [vmem:[#allocation5 + $0x28] sm:$0xff]  ;;  %v174_v21 = vld [vmem:[#allocation5 + $0x20] sm:$0xff] }
  0x13   :  { %v283_v20 = vld [vmem:[#allocation2 + $0x8] sm:$0xff]  ;;  %v173_v22 = vld [vmem:[#allocation5 + $0x18] sm:$0xff]  ;;  %v282_v23 = vld [vmem:[#allocation2] sm:$0xff] }
  0x14   :  { %189 = vmatpush.msra.mxu1 %v182_v9  ;;  %v172_v24 = vld [vmem:[#allocation5 + $0x10] sm:$0xff]  ;;  %v171_v25 = vld [vmem:[#allocation5 + $0x8] sm:$0xff]  ;;  %v281_v26 = vld [vmem:[%s446_s0] sm:$0xff]  ;;  %s388_s0 = smov [#allocation7]  }
  0x15   :  { %135 = vmatpush.bf16.msra.mxu0 %v287_v8  ;;  %v170_v27 = vld [vmem:[#allocation5] sm:$0xff]  ;;  %s225_s12 = sshll.u32 %s388_s0, 4  ;;  %s226_s12 = int_to_ptr.vmem [resolvable:$true] %s225_s12 }
  0x16   :  { %162 = vperm.xlu0 %300, %v155_v7   ;;  %190 = vmatpush.msra.mxu1 %v181_v10  ;;  %v301_v34 = vld [vmem:[%s448_s2] ss:$0 sm:$0xff] }
  0x18   :  { %191 = vmatpush.msra.mxu1 %v180_v12 }
  0x19   :  { %136 = vmatpush.bf16.msra.mxu0 %v286_v11 }
  0x1a   :  { %192 = vmatpush.msra.mxu1 %v179_v13 }
  0x1c   :  { %193 = vmatpush.msra.mxu1 %v178_v15 }
  0x1d   :  { %137 = vmatpush.bf16.msra.mxu0 %v285_v14 }
  0x1e   :  { %194 = vmatpush.msra.mxu1 %v177_v16 }
  0x20   :  { %195 = vmatpush.msra.mxu1 %v176_v18 }
  0x21   :  { %138 = vmatpush.bf16.msra.mxu0 %v284_v17 }
  0x22   :  { %196 = vmatpush.msra.mxu1 %v175_v19 }
  0x24   :  { %197 = vmatpush.msra.mxu1 %v174_v21 }
  0x25   :  { %139 = vmatpush.bf16.msra.mxu0 %v283_v20 }
  0x26   :  { %198 = vmatpush.msra.mxu1 %v173_v22 }
  0x28   :  { %199 = vmatpush.msra.mxu1 %v172_v24 }
  0x29   :  { %140 = vmatpush.bf16.msra.mxu0 %v282_v23 }
  0x2a   :  { %200 = vmatpush.msra.mxu1 %v171_v25 }
  0x2c   :  { %141 = vmatmul.bf16.vlgmr.msra.gmra.mxu0 %v281_v26  ;;  %201 = vmatpush.msra.mxu1 %v170_v27 }
  0x80   :  { %v160_v30 = vpop.permute.xlu0 %159 }
  0x81   :  { %vm164_vm0 = vcmp.eq.s32.totalorder %v160_v30, %v157_v29 }
  0x82   :  { %279 = vmatmul.msk.f32.vlgmr.msra.gmra.mxu1 %vm164_vm0, %v387_v31 }
  0x88   :  { %v163_v32 = vpop.permute.xlu0 %162 }
  0x89   :  { %vm165_vm1 = vcmp.eq.s32.totalorder %v163_v32, %v157_v29 }
  0x8a   :  { %280 = vmatmul.msk.f32.gmra.mxu1 %vm165_vm1, %v387_v31 }
  0xa9   :  { %v142_v33 = vpop.f32.mrf.mxu0 }
  0xaa   :  { %v215_v35 = vadd.f32 %v301_v34, %v142_v33 }
  0xb1   :  { %v144_v36 = vpop.f32.mrf.mxu0 }
  0xb2   :  { %v216_v39 = vadd.f32 %v301_v34, %v144_v36 }
  0xff   :  { %v203_v37 = vpop.f32.mrf.mxu1 }
 0x100   :  { %v217_v38 = vmul.f32 %v215_v35, %v203_v37 }
 0x102   :  { %219 = vst [vmem:[#allocation7] sm:$0xff] %v217_v38 }
 0x107   :  { %v206_v40 = vpop.f32.mrf.mxu1 }
 0x108   :  { %v218_v41 = vmul.f32 %v216_v39, %v206_v40 }
 0x10a   :  { %220 = vst [vmem:[#allocation7 + $0x8] sm:$0xff] %v218_v41 }
 0x10b   :  { %233 = dma.vmem_to_hbm [thread:$0]  %s226_s12, 256, %s228_s15, [#allocation4], %s384_s30, %s384_s30, %s385_s6  }
 0x10c   :  { %378 = dma.done.wait [#allocation4], 256  }
 0x10d   :  { %379 = vsyncadd [#allocation4], 4294967040 }
 0x10e   :  { %238 = vsyncpa [#allocation3], 1 }
 0x10f   :  { %239 = vsyncpa [#allocation6], 1 }
 0x110   :  { %240 = vsyncpa [#allocation4], 1 }

</bundles_post_ra>
